<compile_context>
chip_gen: v7x
topology: tpu7x:2x2x1
jax: 0.10.0
libtpu: 0.0.40
codegen_flags: <defaults>
</compile_context>

<pallas_src>
import functools

import jax
import jax.numpy as jnp
from jax.experimental import pallas as pl
from jax.experimental.pallas import tpu as pltpu  # noqa: F401  (TPU backend)

SUBLANES = 8    # pad batch rows to a full sublane slab
LANES = 128     # pad output lanes to a full vreg width


# ----------------------------------------------------------------------------
# Pallas kernel: entire ensemble in one step.
#   hidden = tanh(g_aug @ W1_fused)          # b1 folded into W1 via ones column
#   out    = hidden @ W2_blockdiag + b2_row  # lane-padded to 128
# ----------------------------------------------------------------------------
def ensemble_kernel(g_ref, w1_ref, w2_ref, b2_ref, out_ref):
    h = jnp.tanh(
        jnp.dot(g_ref[...], w1_ref[...], preferred_element_type=jnp.float32))
    out_ref[...] = (
        jnp.dot(h, w2_ref[...], preferred_element_type=jnp.float32)
        + b2_ref[...])


def ensemble_forward(g_rows, w1f, w2f, b2f):
    """Evaluate the whole ensemble on every row of g_rows ((n_rows, D)) in a
    single pallas_call / single grid step.  Returns an (8, 128) lane-dense
    output slab; valid data lives in [:n_rows, :n_nets*O]."""
    n_rows, D = g_rows.shape
    # Fold b1: append a constant-1 feature; pad batch to 8 sublanes so the
    # single output store is a full, unmasked vreg-aligned slab.
    g_aug = jnp.concatenate(
        [g_rows, jnp.ones((n_rows, 1), jnp.float32)], axis=1)
    g_pad = jnp.zeros((SUBLANES, D + 1), jnp.float32).at[:n_rows, :].set(g_aug)

    # Grid collapsed: no grid / no BlockSpecs -> whole arrays resident in VMEM
    # (total footprint ~60 KB, far under scoped VMEM on v5e/v6e/v7x).
    return pl.pallas_call(
        ensemble_kernel,
        out_shape=jax.ShapeDtypeStruct((SUBLANES, LANES), jnp.float32),
    )(g_pad, w1f, w2f, b2f)


# ----------------------------------------------------------------------------
# One-time weight fusion (wrapper-side, outside the kernel)
# ----------------------------------------------------------------------------
def fuse_ensemble_params(w1, b1, w2, b2):
    """w1: (n, D, H), b1: (n, 1, H), w2: (n, H, O), b2: (n, 1, O)
    Returns:
      w1f: (D+1, n*H)  layer-1 weights with b1 folded in as the last row
      w2f: (n*H, 128)  block-diagonal layer-2 weights, lane-padded to 128
      b2f: (1, 128)    concatenated layer-2 biases, lane-padded
    Output column layout matches torch.cat([m(g) for m in model], dim=1):
    [net0 outputs | net1 outputs | ...]."""
    n, D, H = w1.shape
    O = w2.shape[-1]
    w1f = jnp.concatenate(
        [jnp.transpose(w1, (1, 0, 2)).reshape(D, n * H),
         b1.reshape(1, n * H)], axis=0).astype(jnp.float32)
    w2f = jnp.zeros((n * H, LANES), jnp.float32)
    for i in range(n):
        w2f = w2f.at[i * H:(i + 1) * H, i * O:(i + 1) * O].set(w2[i])
    b2f = jnp.zeros((1, LANES), jnp.float32).at[0, :n * O].set(b2.reshape(-1))
    return w1f, w2f, b2f


# ----------------------------------------------------------------------------
# Plain-JAX glue reproducing the rest of LagInsulator.forward
# ----------------------------------------------------------------------------
def clip_norm(g, eps=1e-12):
    # eps guard only kicks in for a degenerate ~zero-norm g (avoids Inf/NaN).
    norm = jnp.maximum(jnp.linalg.norm(g), eps)
    return jnp.where(norm < 0.75, g * (0.7 / norm),
                     jnp.where(norm > 1.0, g / norm, g))


# TODO(synk): complex64 gauge transformation has no Pallas TPU equivalent
# (no complex dtype in-kernel); it stays in plain JAX glue (not a hot path).
def gauge_trans(g, N, eps=1e-12):
    g0 = g[0]
    gp = (g0[2 * N + 1:4 * N + 1] + 1j * g0[4 * N + 1:]).astype(jnp.complex64)
    theta = jnp.conj(gp[N]) / jnp.maximum(jnp.abs(gp[N]), eps)
    phi = jnp.conj(gp[N - 1]) / jnp.maximum(jnp.abs(gp[N - 1]), eps)
    gp = gp * (phi ** N / theta ** (N - 1)) * (theta / phi) ** jnp.arange(2 * N)
    g_ = (g0[:N + 1] + 1j * jnp.concatenate(
        [jnp.zeros((1,), jnp.float32), g0[N + 1:2 * N + 1]])
          ).astype(jnp.complex64)
    g_ = g_ * (theta / phi) ** jnp.arange(N + 1)
    temp = jnp.concatenate(
        [jnp.real(g_), jnp.imag(g_)[1:], jnp.real(gp), jnp.imag(gp)])
    return temp[None, :].astype(jnp.float32)


def lag_insulator_forward(g, w1f, w2f, b2f, *, tot_o, N, V, U, penalty):
    """Mirrors LagInsulator.forward for the gauge=False case (g has 6N+1
    entries).  Returns (loss, H, P, Pmax, Pg)."""
    g = clip_norm(g)                                 # Clip_Norm()
    temp = gauge_trans(g, N)                         # torch.no_grad gauge row

    # Both ensemble evaluations in ONE pallas_call (rows 0 and 1).
    g_rows = jnp.concatenate([g, temp], axis=0)      # (2, D)
    out = ensemble_forward(g_rows, w1f, w2f, b2f)    # (8, 128) slab
    vals = out[:2, :tot_o]                           # valid outputs
    P = jnp.mean(vals[0])                            # torch.mean(cat(...))
    Pmax = jnp.max(vals[0])                          # torch.max(cat(...))
    Pg = jnp.mean(vals[1])                           # mean over gauge row

    g0 = g[0]
    H = (-(g0[3 * N + 1] + g0[3 * N])
         + V * (0.5 - 0.5 * g0[0] ** 2
                - 0.25 * g0[3 * N + 1] ** 2 - 0.25 * g0[5 * N + 1] ** 2
                - 0.25 * g0[3 * N] ** 2 - 0.25 * g0[5 * N] ** 2)
         + 0.5 * U * (g0[0] ** 2 - g0[1] ** 2 - g0[N + 1] ** 2))

    loss = H + penalty * P
    return loss, H, P, Pmax, Pg


# ----------------------------------------------------------------------------
# Deterministic parameter / input construction (stands in for torch.load'ed
# pretrained nets).
# ----------------------------------------------------------------------------
def make_params(key, n_nets, D, H, O):
    k1, k2, k3, k4 = jax.random.split(key, 4)
    w1 = jax.random.normal(k1, (n_nets, D, H), jnp.float32) * 0.2
    b1 = jax.random.normal(k2, (n_nets, 1, H), jnp.float32) * 0.05
    w2 = jax.random.normal(k3, (n_nets, H, O), jnp.float32) * 0.2
    b2 = jax.random.normal(k4, (n_nets, 1, O), jnp.float32) * 0.05
    return w1, b1, w2, b2


if __name__ == "__main__":
    # Small, forward-consistent shapes
    N = 4                 # chain length parameter -> g has 6N+1 = 25 entries
    D = 6 * N + 1         # gauge = False branch
    HID = 32              # hidden width of each synthetic pretrained net
    O = 4                 # per-net output width
    N_NETS = 3            # len(Nets)
    V, U, PENALTY = 1.0, 2.0, 0.5

    key = jax.random.PRNGKey(0)
    k_init, k_params = jax.random.split(key)

    # init (the nn.Parameter g): deterministic, shape (1, 6N+1)
    init = jax.random.normal(k_init, (D,), jnp.float32) * 0.2
    g = init[None, :]

    w1, b1, w2, b2 = make_params(k_params, N_NETS, D, HID, O)
    w1f, w2f, b2f = fuse_ensemble_params(w1, b1, w2, b2)   # fuse once, outside

    fwd = jax.jit(functools.partial(
        lag_insulator_forward,
        tot_o=N_NETS * O, N=N, V=V, U=U, penalty=PENALTY))

    loss, H, P, Pmax, Pg = fwd(g, w1f, w2f, b2f)
    jax.block_until_ready((loss, H, P, Pmax, Pg))

    print("KERNEL_OK")
</pallas_src>

<mosaic_0001>
module attributes {stable_mosaic.version = 11 : i64} {
  func.func @ensemble_kernel(%arg0: memref<8x26xf32, #tpu.memory_space<vmem>>, %arg1: memref<26x96xf32, #tpu.memory_space<vmem>>, %arg2: memref<96x128xf32, #tpu.memory_space<vmem>>, %arg3: memref<1x128xf32, #tpu.memory_space<vmem>>, %arg4: memref<8x128xf32, #tpu.memory_space<vmem>>) attributes {dimension_semantics = [], scalar_prefetch = 0 : i64, scratch_operands = 0 : i64, tpu.core_type = #tpu.core_type<tc>} {
    %c0 = arith.constant 0 : index
    %c0_0 = arith.constant 0 : index
    %0 = vector.load %arg0[%c0, %c0_0] : memref<8x26xf32, #tpu.memory_space<vmem>>, vector<8x26xf32>
    %c0_1 = arith.constant 0 : index
    %c0_2 = arith.constant 0 : index
    %1 = vector.load %arg1[%c0_1, %c0_2] : memref<26x96xf32, #tpu.memory_space<vmem>>, vector<26x96xf32>
    %cst = arith.constant dense<0.000000e+00> : vector<8x96xf32>
    %2 = tpu.matmul %0, %1, %cst {dimension_numbers = #tpu.dot_dimension_numbers<[1], [0], [0], [1], [0, 0, 1, 1], [], []>} : vector<8x26xf32>, vector<26x96xf32>, vector<8x96xf32> -> vector<8x96xf32>
    %3 = math.tanh %2 : vector<8x96xf32>
    %c0_3 = arith.constant 0 : index
    %c0_4 = arith.constant 0 : index
    %4 = vector.load %arg2[%c0_3, %c0_4] : memref<96x128xf32, #tpu.memory_space<vmem>>, vector<96x128xf32>
    %cst_5 = arith.constant dense<0.000000e+00> : vector<8x128xf32>
    %5 = tpu.matmul %3, %4, %cst_5 {dimension_numbers = #tpu.dot_dimension_numbers<[1], [0], [0], [1], [0, 0, 1, 1], [], []>} : vector<8x96xf32>, vector<96x128xf32>, vector<8x128xf32> -> vector<8x128xf32>
    %c0_6 = arith.constant 0 : index
    %c0_7 = arith.constant 0 : index
    %6 = vector.load %arg3[%c0_6, %c0_7] : memref<1x128xf32, #tpu.memory_space<vmem>>, vector<1x128xf32>
    %7 = vector.broadcast %6 : vector<1x128xf32> to vector<8x128xf32>
    %8 = arith.addf %5, %7 : vector<8x128xf32>
    %c0_8 = arith.constant 0 : index
    %c0_9 = arith.constant 0 : index
    %9 = vector.load %arg4[%c0_8, %c0_9] : memref<8x128xf32, #tpu.memory_space<vmem>>, vector<8x128xf32>
    tpu.vector_store %arg4[%c0_8, %c0_9], %8 {strides = array<i32>} : memref<8x128xf32, #tpu.memory_space<vmem>>, vector<8x128xf32>,
    return
  }
}

</mosaic_0001>

<bundles_post_ra>
// kernel: lag_insulator_forward.1
= control target key start
LH: loop header
LB: loop body
LE: loop exit
PB: predicated region body
PF: predicated region fallthrough
CT: control target
= control target key end

     0   :  { %v290_v0 = vmov 0.0|0.0   ;;  %vm26_vm0 = vcmask 1041408   ;;  %vm291_vm1 = vmmov 0   ;;  %v292_v6 = vmov 0.0   ;;  %s376_s1 = inlined_call_operand.vmem [shape: f32[26,96], index: 1, kind: input, shape index: {}]   ;;  %s377_s2 = inlined_call_operand.vmem [shape: f32[96,128], index: 2, kind: input, shape index: {}]   ;;  %s378_s0 = inlined_call_operand.vmem [shape: f32[8,26], index: 0, kind: input, shape index: {}]   ;;  %s379_s3 = inlined_call_operand.vmem [shape: f32[1,128], index: 3, kind: input, shape index: {}]   ;;  %s380_s4 = inlined_call_operand.vmem [shape: f32[8,128], index: 4, kind: output, shape index: {}]  }
   0x1   :  { %259 = vmatprep.subr.bf16.mxu0 %v290_v0  ;;  %v18_v1 = vld [vmem:[%s376_s1] sm:$0xff]  ;;  %v19_v2 = vld [vmem:[%s376_s1 + $0x8] sm:$0xff]  ;;  %v20_v3 = vld [vmem:[%s376_s1 + $0x10] sm:$0xff]  ;;  %266 = vmatprep.subr.bf16.mxu1 %v290_v0  ;;  %vm293_vm2 = vmmov 1   ;;  %vm22_vm4 = vcmask 211968   ;;  %vm120_vm5 = vcmask 785408  }
   0x2   :  { %v260_v4 = vpack.c.bf16 %v19_v2, %v18_v1  ;;  %v21_v5 = vld [vmem:[%s376_s1 + $0x18] sm:$0x3]  ;;  %229 = vmatprep.mubr.msk.f32.mxu0 %vm291_vm1, %v292_v6  ;;  %256 = vmatprep.mubr.msk.f32.mxu1 %vm291_vm1, %v292_v6  ;;  %v101_v7 = vld [vmem:[%s377_s2] sm:$0xff]  ;;  %v102_v8 = vld [vmem:[%s377_s2 + $0x8] sm:$0xff] }
   0x3   :  { %v103_v9 = vld [vmem:[%s377_s2 + $0x10] sm:$0xff]  ;;  %v263_v10 = vpack.c.bf16 %v21_v5, %v20_v3  ;;  %v267_v11 = vpack.c.bf16 %v102_v8, %v101_v7  ;;  %v104_v12 = vld [vmem:[%s377_s2 + $0x18] sm:$0xff]  ;;  %vm264_vm3 = vmpackc.low %vm26_vm0, %vm293_vm2 }
   0x4   :  { %261 = vmatpush3.bf16.msra.mxu0 %v260_v4  ;;  %v270_v13 = vpack.c.bf16 %v104_v12, %v103_v9  ;;  %v105_v14 = vld [vmem:[%s377_s2 + $0x20] sm:$0xff]  ;;  %v106_v15 = vld [vmem:[%s377_s2 + $0x28] sm:$0xff]  ;;  %v107_v18 = vld [vmem:[%s377_s2 + $0x30] sm:$0xff] }
   0x5   :  { %262 = vmatprep.subr.bf16.mxu0 %v290_v0  ;;  %268 = vmatpush3.bf16.msra.mxu1 %v267_v11  ;;  %v17_v16 = vld [vmem:[%s378_s0] sm:$0xff]  ;;  %v273_v17 = vpack.c.bf16 %v106_v15, %v105_v14  ;;  %v108_v19 = vld [vmem:[%s377_s2 + $0x38] sm:$0xff]  ;;  %v110_v22 = vld [vmem:[%s377_s2 + $0x48] sm:$0xff] }
   0x6   :  { %269 = vmatprep.subr.bf16.mxu1 %v290_v0  ;;  %v276_v20 = vpack.c.bf16 %v108_v19, %v107_v18  ;;  %v109_v21 = vld [vmem:[%s377_s2 + $0x40] sm:$0xff]  ;;  %v111_v24 = vld [vmem:[%s377_s2 + $0x50] sm:$0xff]  ;;  %v112_v25 = vld [vmem:[%s377_s2 + $0x58] sm:$0xff] }
   0x7   :  { %v279_v23 = vpack.c.bf16 %v110_v22, %v109_v21  ;;  %v282_v26 = vpack.c.bf16 %v112_v25, %v111_v24  ;;  %v201_v30 = vld [vmem:[%s379_s3] ss:$0 sm:$0xff] }
   0x8   :  { %265 = vmatpush3.bf16.msk.msra.mxu0 %vm264_vm3, %v263_v10 }
   0x9   :  { %271 = vmatpush3.bf16.msra.mxu1 %v270_v13 }
   0xa   :  { %272 = vmatprep.subr.bf16.mxu1 %v290_v0 }
   0xb   :  { %230 = vmatmul.mubr.msk.f32.vlgmr.msra.gmra.mrb[0].mxu0 %vm22_vm4, %v17_v16 }
   0xd   :  { %274 = vmatpush3.bf16.msra.mxu1 %v273_v17 }
   0xe   :  { %275 = vmatprep.subr.bf16.mxu1 %v290_v0 }
  0x11   :  { %277 = vmatpush3.bf16.msra.mxu1 %v276_v20 }
  0x12   :  { %278 = vmatprep.subr.bf16.mxu1 %v290_v0 }
  0x15   :  { %280 = vmatpush3.bf16.msra.mxu1 %v279_v23 }
  0x16   :  { %281 = vmatprep.subr.bf16.mxu1 %v290_v0 }
  0x19   :  { %283 = vmatpush3.bf16.msra.mxu1 %v282_v26 }
  0xde   :  { %v96_v27 = vpop.f32.mrb[0].mxu0 }
  0xdf   :  { %288 = vtanh.f32 %v96_v27  ;;  %v231_v28 = vpop.f32.mrb[1].mxu0 }
  0xe9   :  { %v289_v29 = vpop.eup %288 }
  0xea   :  { %257 = vmatmul.mubr.msk.f32.vlgmr.msra.gmra.mrb[0].mxu1 %vm120_vm5, %v289_v29 }
 0x1bd   :  { %v190_v31 = vpop.f32.mrb[0].mxu1 }
 0x1be   :  { %v191_v32 = vadd.f32 %v201_v30, %v190_v31  ;;  %v258_v33 = vpop.f32.mrb[1].mxu1 }
 0x1c0   :  { %194 = vst [vmem:[%s380_s4] sm:$0xff] %v191_v32 }

</bundles_post_ra>
